<compile_context>
chip_gen: v7x
topology: tpu7x:2x2x1
jax: 0.10.0
libtpu: 0.0.40
codegen_flags: <defaults>
</compile_context>

<pallas_src>
import functools

import jax
import jax.numpy as jnp
from jax.experimental import pallas as pl
from jax.experimental.pallas import tpu as pltpu


def _new_encoder_kernel(x_ref, wq_ref, wk_ref, wv_ref,
                        w1_ref, b1_ref, w2t_ref, b2_ref,
                        out_ref, *, num_heads, tile_b, seq_n):
    q_dim = x_ref.shape[-1]
    dim_k = wq_ref.shape[-1]
    dim_v = wv_ref.shape[-1]
    hidden_size = w1_ref.shape[-1]
    dk = dim_k // num_heads
    dv = dim_v // num_heads
    rows = tile_b * seq_n

    # ---- fused projections over the whole batch tile (large MXU matmuls) ----
    x = x_ref[...].reshape(rows, q_dim)                                   # (rows, Q)
    q = jnp.dot(x, wq_ref[...], preferred_element_type=jnp.float32)      # (rows, K)
    k = jnp.dot(x, wk_ref[...], preferred_element_type=jnp.float32)      # (rows, K)
    v = jnp.dot(x, wv_ref[...], preferred_element_type=jnp.float32)      # (rows, V)

    q3 = q.reshape(tile_b, seq_n, dim_k)
    k3 = k.reshape(tile_b, seq_n, dim_k)
    v3 = v.reshape(tile_b, seq_n, dim_v)

    scale = 1.0 / (dk ** 0.5)

    # ---- per-head scaled dot-product attention, batched over the tile ----
    head_outs = []
    for h in range(num_heads):
        qh = q3[:, :, h * dk:(h + 1) * dk]                                # (b, n, dk)
        kh = k3[:, :, h * dk:(h + 1) * dk]                                # (b, n, dk)
        vh = v3[:, :, h * dv:(h + 1) * dv]                                # (b, n, dv)
        s = jnp.einsum('bqd,bkd->bqk', qh, kh,
                       preferred_element_type=jnp.float32) * scale       # (b, n, n)
        s = s - jnp.max(s, axis=-1, keepdims=True)
        p = jnp.exp(s)
        p = p * pl.reciprocal(jnp.sum(p, axis=-1, keepdims=True), approx=True)
        head_outs.append(jnp.einsum('bqk,bkd->bqd', p, vh,
                                    preferred_element_type=jnp.float32))  # (b, n, dv)
    word_att3 = jnp.concatenate(head_outs, axis=-1)                       # (b, n, V)
    word_att = word_att3.reshape(rows, dim_v)                             # (rows, V)

    # ---- news_layer: Linear -> Tanh -> Linear(1) -> softmax over seq ----
    hidden = jnp.tanh(jnp.dot(word_att, w1_ref[...],
                              preferred_element_type=jnp.float32)
                      + b1_ref[...])                                      # (rows, H)
    # Second Linear has a single output unit: do it as multiply + lane reduce
    # in (b, n, H) layout so logits come out directly as lane-dense (b, n).
    hidden3 = hidden.reshape(tile_b, seq_n, hidden_size)
    w2row = w2t_ref[...].reshape(1, 1, hidden_size)
    logits = jnp.sum(hidden3 * w2row, axis=-1) + b2_ref[0]                # (b, n)

    logits = logits - jnp.max(logits, axis=-1, keepdims=True)
    e = jnp.exp(logits)
    attn_w = e * pl.reciprocal(jnp.sum(e, axis=-1, keepdims=True), approx=True)  # (b, n)

    # ---- attentive pooling as a batched (1, n) x (n, V) matmul ----
    attn_w3 = attn_w.reshape(tile_b, 1, seq_n)
    pooled = jnp.einsum('bqk,bkd->bqd', attn_w3, word_att3,
                        preferred_element_type=jnp.float32)               # (b, 1, V)
    out_ref[...] = pooled[:, 0, :]


def new_encoder_forward(x, params, *, num_heads, tile_b=None):
    """x: (batch, n, Q_dim) f32. Returns (batch, V_dim) f32."""
    batch, n, q_dim = x.shape
    wq, wk, wv, w1, b1, w2, b2 = params
    dim_k = wq.shape[1]
    dim_v = wv.shape[1]
    hidden_size = w1.shape[1]

    if tile_b is None:
        # Aim for >=256 MXU rows per grid step (v6e/v7x; also fills v5e's 128),
        # but never pad a tiny batch up just for that.
        tile_b = max(1, min(batch, -(-256 // n)))
    grid_b = pl.cdiv(batch, tile_b)
    batch_pad = grid_b * tile_b
    if batch_pad != batch:
        x = jnp.pad(x, ((0, batch_pad - batch), (0, 0), (0, 0)))

    w2t = w2.reshape(1, hidden_size)   # (H, 1) -> (1, H) row vector
    b2s = b2.reshape((1,))             # scalar -> 1-D SMEM array

    kernel = functools.partial(_new_encoder_kernel, num_heads=num_heads,
                               tile_b=tile_b, seq_n=n)

    out = pl.pallas_call(
        kernel,
        out_shape=jax.ShapeDtypeStruct((batch_pad, dim_v), jnp.float32),
        grid_spec=pltpu.PrefetchScalarGridSpec(
            num_scalar_prefetch=0,
            grid=(grid_b,),
            in_specs=[
                pl.BlockSpec((tile_b, n, q_dim), lambda b: (b, 0, 0)),    # x tile
                pl.BlockSpec((q_dim, dim_k), lambda b: (0, 0)),           # Wq^T
                pl.BlockSpec((q_dim, dim_k), lambda b: (0, 0)),           # Wk^T
                pl.BlockSpec((q_dim, dim_v), lambda b: (0, 0)),           # Wv^T
                pl.BlockSpec((dim_v, hidden_size), lambda b: (0, 0)),     # W1^T
                pl.BlockSpec((1, hidden_size), lambda b: (0, 0)),         # b1
                pl.BlockSpec((1, hidden_size), lambda b: (0, 0)),         # W2^T row
                pl.BlockSpec(memory_space=pltpu.MemorySpace.SMEM),        # b2 scalar
            ],
            out_specs=pl.BlockSpec((tile_b, dim_v), lambda b: (b, 0)),
        ),
        compiler_params=pltpu.CompilerParams(
            dimension_semantics=("parallel",)),
    )(x, wq, wk, wv, w1, b1, w2t, b2s)
    return out[:batch]


def _reference_forward(x, params, *, num_heads):
    """Pure-JAX reference matching the PyTorch module (dropout = identity)."""
    wq, wk, wv, w1, b1, w2, b2 = params
    batch, n, _ = x.shape
    dim_k = wq.shape[1]
    dim_v = wv.shape[1]
    dk = dim_k // num_heads
    dv = dim_v // num_heads

    q = (x @ wq).reshape(batch, n, num_heads, dk).transpose(0, 2, 1, 3)
    k = (x @ wk).reshape(batch, n, num_heads, dk).transpose(0, 2, 1, 3)
    v = (x @ wv).reshape(batch, n, num_heads, dv).transpose(0, 2, 1, 3)
    dist = jnp.einsum('bhqd,bhkd->bhqk', q, k) / jnp.sqrt(jnp.float32(dk))
    dist = jax.nn.softmax(dist, axis=-1)
    att = jnp.einsum('bhqk,bhkd->bhqd', dist, v)
    word_att = att.transpose(0, 2, 1, 3).reshape(batch, n, dim_v)

    hiddenp = jnp.tanh(word_att @ w1 + b1[0])
    logits = (hiddenp @ w2 + b2[0]).reshape(batch, n)
    attn_w = jax.nn.softmax(logits, axis=1)[..., None]
    return jnp.sum(word_att * attn_w, axis=1)


if __name__ == "__main__":
    # Small shapes consistent with the module.
    BATCH, N = 2, 8
    Q_DIM, K_DIM, V_DIM, HEADS = 32, 32, 32, 4
    HIDDEN = 32

    key = jax.random.PRNGKey(0)
    ks = jax.random.split(key, 9)

    x = jax.random.normal(ks[0], (BATCH, N, Q_DIM), dtype=jnp.float32)

    # Deterministic parameter init (PyTorch Linear weights are (out, in); we
    # store them pre-transposed as (in, out)).
    wq = jax.random.normal(ks[1], (Q_DIM, K_DIM), dtype=jnp.float32) * 0.1
    wk = jax.random.normal(ks[2], (Q_DIM, K_DIM), dtype=jnp.float32) * 0.1
    wv = jax.random.normal(ks[3], (Q_DIM, V_DIM), dtype=jnp.float32) * 0.1
    w1 = jax.random.normal(ks[4], (V_DIM, HIDDEN), dtype=jnp.float32) * 0.1
    b1 = jax.random.normal(ks[5], (1, HIDDEN), dtype=jnp.float32) * 0.1
    w2 = jax.random.normal(ks[6], (HIDDEN, 1), dtype=jnp.float32) * 0.1
    b2 = jax.random.normal(ks[7], (1, 1), dtype=jnp.float32) * 0.1
    params = (wq, wk, wv, w1, b1, w2, b2)

    # Tolerance is 2e-3 because the softmax denominators use the EUP
    # approximate reciprocal (~1e-3 relative error).
    out = new_encoder_forward(x, params, num_heads=HEADS)
    out = jax.block_until_ready(out)
    ref = _reference_forward(x, params, num_heads=HEADS)
    assert out.shape == (BATCH, V_DIM)
    assert jnp.allclose(out, ref, atol=2e-3, rtol=2e-3), "mismatch vs reference"

    # Second check: exercises batch tiling + padding (batch not divisible by tile).
    x2 = jax.random.normal(ks[8], (10, N, Q_DIM), dtype=jnp.float32)
    out2 = jax.block_until_ready(
        new_encoder_forward(x2, params, num_heads=HEADS, tile_b=4))
    ref2 = _reference_forward(x2, params, num_heads=HEADS)
    assert out2.shape == (10, V_DIM)
    assert jnp.allclose(out2, ref2, atol=2e-3, rtol=2e-3), "mismatch vs reference (tiled)"

    print("KERNEL_OK")
</pallas_src>

<mosaic_0001>
module attributes {stable_mosaic.version = 11 : i64} {
  func.func @_new_encoder_kernel(%arg0: i32, %arg1: memref<2x8x32xf32, #tpu.memory_space<vmem>>, %arg2: memref<32x32xf32, #tpu.memory_space<vmem>>, %arg3: memref<32x32xf32, #tpu.memory_space<vmem>>, %arg4: memref<32x32xf32, #tpu.memory_space<vmem>>, %arg5: memref<32x32xf32, #tpu.memory_space<vmem>>, %arg6: memref<1x32xf32, #tpu.memory_space<vmem>>, %arg7: memref<1x32xf32, #tpu.memory_space<vmem>>, %arg8: memref<1xf32, #tpu.memory_space<smem>>, %arg9: memref<2x32xf32, #tpu.memory_space<vmem>>) attributes {dimension_semantics = [#tpu.dimension_semantics<parallel>], iteration_bounds = array<i64: 1>, scalar_prefetch = 0 : i64, scratch_operands = 0 : i64, tpu.core_type = #tpu.core_type<tc>, window_params = [{transform_indices = @transform_0, window_bounds = array<i64: 2, 8, 32>}, {pipeline_mode = #tpu.pipeline_mode<synchronous>, transform_indices = @transform_1, window_bounds = array<i64: 32, 32>}, {pipeline_mode = #tpu.pipeline_mode<synchronous>, transform_indices = @transform_2, window_bounds = array<i64: 32, 32>}, {pipeline_mode = #tpu.pipeline_mode<synchronous>, transform_indices = @transform_3, window_bounds = array<i64: 32, 32>}, {pipeline_mode = #tpu.pipeline_mode<synchronous>, transform_indices = @transform_4, window_bounds = array<i64: 32, 32>}, {pipeline_mode = #tpu.pipeline_mode<synchronous>, transform_indices = @transform_5, window_bounds = array<i64: 1, 32>}, {pipeline_mode = #tpu.pipeline_mode<synchronous>, transform_indices = @transform_6, window_bounds = array<i64: 1, 32>}, {transform_indices = @transform_7, window_bounds = array<i64: 1>}, {transform_indices = @transform_8, window_bounds = array<i64: 2, 32>}]} {
    %c0 = arith.constant 0 : index
    %c0_0 = arith.constant 0 : index
    %c0_1 = arith.constant 0 : index
    %0 = vector.load %arg1[%c0, %c0_0, %c0_1] : memref<2x8x32xf32, #tpu.memory_space<vmem>>, vector<2x8x32xf32>
    %1 = vector.shape_cast %0 : vector<2x8x32xf32> to vector<16x32xf32>
    %c0_2 = arith.constant 0 : index
    %c0_3 = arith.constant 0 : index
    %2 = vector.load %arg2[%c0_2, %c0_3] : memref<32x32xf32, #tpu.memory_space<vmem>>, vector<32x32xf32>
    %cst = arith.constant dense<0.000000e+00> : vector<16x32xf32>
    %3 = tpu.matmul %1, %2, %cst {dimension_numbers = #tpu.dot_dimension_numbers<[1], [0], [0], [1], [0, 0, 1, 1], [], []>} : vector<16x32xf32>, vector<32x32xf32>, vector<16x32xf32> -> vector<16x32xf32>
    %c0_4 = arith.constant 0 : index
    %c0_5 = arith.constant 0 : index
    %4 = vector.load %arg3[%c0_4, %c0_5] : memref<32x32xf32, #tpu.memory_space<vmem>>, vector<32x32xf32>
    %cst_6 = arith.constant dense<0.000000e+00> : vector<16x32xf32>
    %5 = tpu.matmul %1, %4, %cst_6 {dimension_numbers = #tpu.dot_dimension_numbers<[1], [0], [0], [1], [0, 0, 1, 1], [], []>} : vector<16x32xf32>, vector<32x32xf32>, vector<16x32xf32> -> vector<16x32xf32>
    %c0_7 = arith.constant 0 : index
    %c0_8 = arith.constant 0 : index
    %6 = vector.load %arg4[%c0_7, %c0_8] : memref<32x32xf32, #tpu.memory_space<vmem>>, vector<32x32xf32>
    %cst_9 = arith.constant dense<0.000000e+00> : vector<16x32xf32>
    %7 = tpu.matmul %1, %6, %cst_9 {dimension_numbers = #tpu.dot_dimension_numbers<[1], [0], [0], [1], [0, 0, 1, 1], [], []>} : vector<16x32xf32>, vector<32x32xf32>, vector<16x32xf32> -> vector<16x32xf32>
    %8 = vector.shape_cast %3 : vector<16x32xf32> to vector<2x8x32xf32>
    %9 = vector.shape_cast %5 : vector<16x32xf32> to vector<2x8x32xf32>
    %10 = vector.shape_cast %7 : vector<16x32xf32> to vector<2x8x32xf32>
    %11 = vector.extract_strided_slice %8 {offsets = [0, 0, 0], sizes = [2, 8, 8], strides = [1, 1, 1]} : vector<2x8x32xf32> to vector<2x8x8xf32>
    %12 = vector.extract_strided_slice %9 {offsets = [0, 0, 0], sizes = [2, 8, 8], strides = [1, 1, 1]} : vector<2x8x32xf32> to vector<2x8x8xf32>
    %13 = vector.extract_strided_slice %10 {offsets = [0, 0, 0], sizes = [2, 8, 8], strides = [1, 1, 1]} : vector<2x8x32xf32> to vector<2x8x8xf32>
    "tpu.trace_start"() <{level = 10 : i32, message = "bqd,bkd->bqk"}> : () -> ()
    %cst_10 = arith.constant dense<0.000000e+00> : vector<2x8x8xf32>
    %14 = tpu.matmul %11, %12, %cst_10 {dimension_numbers = #tpu.dot_dimension_numbers<[2], [2], [1], [1], [0, 0, 0, 1, 1, 1], [0], [0]>} : vector<2x8x8xf32>, vector<2x8x8xf32>, vector<2x8x8xf32> -> vector<2x8x8xf32>
    "tpu.trace_stop"() : () -> ()
    %cst_11 = arith.constant 0.353553385 : f32
    %15 = vector.broadcast %cst_11 : f32 to vector<2x8x8xf32>
    %16 = arith.mulf %14, %15 : vector<2x8x8xf32>
    %cst_12 = arith.constant dense<0xFF800000> : vector<2x8xf32>
    %17 = vector.multi_reduction <maximumf>, %16, %cst_12 [2] : vector<2x8x8xf32> to vector<2x8xf32>
    %18 = vector.shape_cast %17 : vector<2x8xf32> to vector<2x8x1xf32>
    %19 = vector.broadcast %18 : vector<2x8x1xf32> to vector<2x8x8xf32>
    %20 = arith.subf %16, %19 : vector<2x8x8xf32>
    %21 = math.exp %20 : vector<2x8x8xf32>
    %cst_13 = arith.constant dense<0.000000e+00> : vector<2x8xf32>
    %22 = vector.multi_reduction <add>, %21, %cst_13 [2] : vector<2x8x8xf32> to vector<2x8xf32>
    %23 = vector.shape_cast %22 : vector<2x8xf32> to vector<2x8x1xf32>
    %24 = tpu.reciprocal %23 {approx = true} : vector<2x8x1xf32> -> vector<2x8x1xf32>
    %25 = vector.broadcast %24 : vector<2x8x1xf32> to vector<2x8x8xf32>
    %26 = arith.mulf %21, %25 : vector<2x8x8xf32>
    "tpu.trace_start"() <{level = 10 : i32, message = "bqk,bkd->bqd"}> : () -> ()
    %cst_14 = arith.constant dense<0.000000e+00> : vector<2x8x8xf32>
    %27 = tpu.matmul %26, %13, %cst_14 {dimension_numbers = #tpu.dot_dimension_numbers<[2], [1], [1], [2], [0, 0, 0, 1, 1, 2], [0], [0]>} : vector<2x8x8xf32>, vector<2x8x8xf32>, vector<2x8x8xf32> -> vector<2x8x8xf32>
    "tpu.trace_stop"() : () -> ()
    %28 = vector.extract_strided_slice %8 {offsets = [0, 0, 8], sizes = [2, 8, 8], strides = [1, 1, 1]} : vector<2x8x32xf32> to vector<2x8x8xf32>
    %29 = vector.extract_strided_slice %9 {offsets = [0, 0, 8], sizes = [2, 8, 8], strides = [1, 1, 1]} : vector<2x8x32xf32> to vector<2x8x8xf32>
    %30 = vector.extract_strided_slice %10 {offsets = [0, 0, 8], sizes = [2, 8, 8], strides = [1, 1, 1]} : vector<2x8x32xf32> to vector<2x8x8xf32>
    "tpu.trace_start"() <{level = 10 : i32, message = "bqd,bkd->bqk"}> : () -> ()
    %cst_15 = arith.constant dense<0.000000e+00> : vector<2x8x8xf32>
    %31 = tpu.matmul %28, %29, %cst_15 {dimension_numbers = #tpu.dot_dimension_numbers<[2], [2], [1], [1], [0, 0, 0, 1, 1, 1], [0], [0]>} : vector<2x8x8xf32>, vector<2x8x8xf32>, vector<2x8x8xf32> -> vector<2x8x8xf32>
    "tpu.trace_stop"() : () -> ()
    %cst_16 = arith.constant 0.353553385 : f32
    %32 = vector.broadcast %cst_16 : f32 to vector<2x8x8xf32>
    %33 = arith.mulf %31, %32 : vector<2x8x8xf32>
    %cst_17 = arith.constant dense<0xFF800000> : vector<2x8xf32>
    %34 = vector.multi_reduction <maximumf>, %33, %cst_17 [2] : vector<2x8x8xf32> to vector<2x8xf32>
    %35 = vector.shape_cast %34 : vector<2x8xf32> to vector<2x8x1xf32>
    %36 = vector.broadcast %35 : vector<2x8x1xf32> to vector<2x8x8xf32>
    %37 = arith.subf %33, %36 : vector<2x8x8xf32>
    %38 = math.exp %37 : vector<2x8x8xf32>
    %cst_18 = arith.constant dense<0.000000e+00> : vector<2x8xf32>
    %39 = vector.multi_reduction <add>, %38, %cst_18 [2] : vector<2x8x8xf32> to vector<2x8xf32>
    %40 = vector.shape_cast %39 : vector<2x8xf32> to vector<2x8x1xf32>
    %41 = tpu.reciprocal %40 {approx = true} : vector<2x8x1xf32> -> vector<2x8x1xf32>
    %42 = vector.broadcast %41 : vector<2x8x1xf32> to vector<2x8x8xf32>
    %43 = arith.mulf %38, %42 : vector<2x8x8xf32>
    "tpu.trace_start"() <{level = 10 : i32, message = "bqk,bkd->bqd"}> : () -> ()
    %cst_19 = arith.constant dense<0.000000e+00> : vector<2x8x8xf32>
    %44 = tpu.matmul %43, %30, %cst_19 {dimension_numbers = #tpu.dot_dimension_numbers<[2], [1], [1], [2], [0, 0, 0, 1, 1, 2], [0], [0]>} : vector<2x8x8xf32>, vector<2x8x8xf32>, vector<2x8x8xf32> -> vector<2x8x8xf32>
    "tpu.trace_stop"() : () -> ()
    %45 = vector.extract_strided_slice %8 {offsets = [0, 0, 16], sizes = [2, 8, 8], strides = [1, 1, 1]} : vector<2x8x32xf32> to vector<2x8x8xf32>
    %46 = vector.extract_strided_slice %9 {offsets = [0, 0, 16], sizes = [2, 8, 8], strides = [1, 1, 1]} : vector<2x8x32xf32> to vector<2x8x8xf32>
    %47 = vector.extract_strided_slice %10 {offsets = [0, 0, 16], sizes = [2, 8, 8], strides = [1, 1, 1]} : vector<2x8x32xf32> to vector<2x8x8xf32>
    "tpu.trace_start"() <{level = 10 : i32, message = "bqd,bkd->bqk"}> : () -> ()
    %cst_20 = arith.constant dense<0.000000e+00> : vector<2x8x8xf32>
    %48 = tpu.matmul %45, %46, %cst_20 {dimension_numbers = #tpu.dot_dimension_numbers<[2], [2], [1], [1], [0, 0, 0, 1, 1, 1], [0], [0]>} : vector<2x8x8xf32>, vector<2x8x8xf32>, vector<2x8x8xf32> -> vector<2x8x8xf32>
    "tpu.trace_stop"() : () -> ()
    %cst_21 = arith.constant 0.353553385 : f32
    %49 = vector.broadcast %cst_21 : f32 to vector<2x8x8xf32>
    %50 = arith.mulf %48, %49 : vector<2x8x8xf32>
    %cst_22 = arith.constant dense<0xFF800000> : vector<2x8xf32>
    %51 = vector.multi_reduction <maximumf>, %50, %cst_22 [2] : vector<2x8x8xf32> to vector<2x8xf32>
    %52 = vector.shape_cast %51 : vector<2x8xf32> to vector<2x8x1xf32>
    %53 = vector.broadcast %52 : vector<2x8x1xf32> to vector<2x8x8xf32>
    %54 = arith.subf %50, %53 : vector<2x8x8xf32>
    %55 = math.exp %54 : vector<2x8x8xf32>
    %cst_23 = arith.constant dense<0.000000e+00> : vector<2x8xf32>
    %56 = vector.multi_reduction <add>, %55, %cst_23 [2] : vector<2x8x8xf32> to vector<2x8xf32>
    %57 = vector.shape_cast %56 : vector<2x8xf32> to vector<2x8x1xf32>
    %58 = tpu.reciprocal %57 {approx = true} : vector<2x8x1xf32> -> vector<2x8x1xf32>
    %59 = vector.broadcast %58 : vector<2x8x1xf32> to vector<2x8x8xf32>
    %60 = arith.mulf %55, %59 : vector<2x8x8xf32>
    "tpu.trace_start"() <{level = 10 : i32, message = "bqk,bkd->bqd"}> : () -> ()
    %cst_24 = arith.constant dense<0.000000e+00> : vector<2x8x8xf32>
    %61 = tpu.matmul %60, %47, %cst_24 {dimension_numbers = #tpu.dot_dimension_numbers<[2], [1], [1], [2], [0, 0, 0, 1, 1, 2], [0], [0]>} : vector<2x8x8xf32>, vector<2x8x8xf32>, vector<2x8x8xf32> -> vector<2x8x8xf32>
    "tpu.trace_stop"() : () -> ()
    %62 = vector.extract_strided_slice %8 {offsets = [0, 0, 24], sizes = [2, 8, 8], strides = [1, 1, 1]} : vector<2x8x32xf32> to vector<2x8x8xf32>
    %63 = vector.extract_strided_slice %9 {offsets = [0, 0, 24], sizes = [2, 8, 8], strides = [1, 1, 1]} : vector<2x8x32xf32> to vector<2x8x8xf32>
    %64 = vector.extract_strided_slice %10 {offsets = [0, 0, 24], sizes = [2, 8, 8], strides = [1, 1, 1]} : vector<2x8x32xf32> to vector<2x8x8xf32>
    "tpu.trace_start"() <{level = 10 : i32, message = "bqd,bkd->bqk"}> : () -> ()
    %cst_25 = arith.constant dense<0.000000e+00> : vector<2x8x8xf32>
    %65 = tpu.matmul %62, %63, %cst_25 {dimension_numbers = #tpu.dot_dimension_numbers<[2], [2], [1], [1], [0, 0, 0, 1, 1, 1], [0], [0]>} : vector<2x8x8xf32>, vector<2x8x8xf32>, vector<2x8x8xf32> -> vector<2x8x8xf32>
    "tpu.trace_stop"() : () -> ()
    %cst_26 = arith.constant 0.353553385 : f32
    %66 = vector.broadcast %cst_26 : f32 to vector<2x8x8xf32>
    %67 = arith.mulf %65, %66 : vector<2x8x8xf32>
    %cst_27 = arith.constant dense<0xFF800000> : vector<2x8xf32>
    %68 = vector.multi_reduction <maximumf>, %67, %cst_27 [2] : vector<2x8x8xf32> to vector<2x8xf32>
    %69 = vector.shape_cast %68 : vector<2x8xf32> to vector<2x8x1xf32>
    %70 = vector.broadcast %69 : vector<2x8x1xf32> to vector<2x8x8xf32>
    %71 = arith.subf %67, %70 : vector<2x8x8xf32>
    %72 = math.exp %71 : vector<2x8x8xf32>
    %cst_28 = arith.constant dense<0.000000e+00> : vector<2x8xf32>
    %73 = vector.multi_reduction <add>, %72, %cst_28 [2] : vector<2x8x8xf32> to vector<2x8xf32>
    %74 = vector.shape_cast %73 : vector<2x8xf32> to vector<2x8x1xf32>
    %75 = tpu.reciprocal %74 {approx = true} : vector<2x8x1xf32> -> vector<2x8x1xf32>
    %76 = vector.broadcast %75 : vector<2x8x1xf32> to vector<2x8x8xf32>
    %77 = arith.mulf %72, %76 : vector<2x8x8xf32>
    "tpu.trace_start"() <{level = 10 : i32, message = "bqk,bkd->bqd"}> : () -> ()
    %cst_29 = arith.constant dense<0.000000e+00> : vector<2x8x8xf32>
    %78 = tpu.matmul %77, %64, %cst_29 {dimension_numbers = #tpu.dot_dimension_numbers<[2], [1], [1], [2], [0, 0, 0, 1, 1, 2], [0], [0]>} : vector<2x8x8xf32>, vector<2x8x8xf32>, vector<2x8x8xf32> -> vector<2x8x8xf32>
    "tpu.trace_stop"() : () -> ()
    %79 = tpu.concatenate %27, %44, %61, %78 in 2 : vector<2x8x8xf32>, vector<2x8x8xf32>, vector<2x8x8xf32>, vector<2x8x8xf32> -> vector<2x8x32xf32>
    %80 = vector.shape_cast %79 : vector<2x8x32xf32> to vector<16x32xf32>
    %c0_30 = arith.constant 0 : index
    %c0_31 = arith.constant 0 : index
    %81 = vector.load %arg5[%c0_30, %c0_31] : memref<32x32xf32, #tpu.memory_space<vmem>>, vector<32x32xf32>
    %cst_32 = arith.constant dense<0.000000e+00> : vector<16x32xf32>
    %82 = tpu.matmul %80, %81, %cst_32 {dimension_numbers = #tpu.dot_dimension_numbers<[1], [0], [0], [1], [0, 0, 1, 1], [], []>} : vector<16x32xf32>, vector<32x32xf32>, vector<16x32xf32> -> vector<16x32xf32>
    %c0_33 = arith.constant 0 : index
    %c0_34 = arith.constant 0 : index
    %83 = vector.load %arg6[%c0_33, %c0_34] : memref<1x32xf32, #tpu.memory_space<vmem>>, vector<1x32xf32>
    %84 = vector.broadcast %83 : vector<1x32xf32> to vector<16x32xf32>
    %85 = arith.addf %82, %84 : vector<16x32xf32>
    %86 = math.tanh %85 : vector<16x32xf32>
    %87 = vector.shape_cast %86 : vector<16x32xf32> to vector<2x8x32xf32>
    %c0_35 = arith.constant 0 : index
    %c0_36 = arith.constant 0 : index
    %88 = vector.load %arg7[%c0_35, %c0_36] : memref<1x32xf32, #tpu.memory_space<vmem>>, vector<1x32xf32>
    %89 = vector.shape_cast %88 : vector<1x32xf32> to vector<1x1x32xf32>
    %90 = vector.broadcast %89 : vector<1x1x32xf32> to vector<2x8x32xf32>
    %91 = arith.mulf %87, %90 : vector<2x8x32xf32>
    %cst_37 = arith.constant dense<0.000000e+00> : vector<2x8xf32>
    %92 = vector.multi_reduction <add>, %91, %cst_37 [2] : vector<2x8x32xf32> to vector<2x8xf32>
    %c0_38 = arith.constant 0 : index
    %93 = memref.load %arg8[%c0_38] : memref<1xf32, #tpu.memory_space<smem>>
    %94 = vector.broadcast %93 : f32 to vector<2x8xf32>
    %95 = arith.addf %92, %94 : vector<2x8xf32>
    %cst_39 = arith.constant dense<0xFF800000> : vector<2xf32>
    %96 = vector.multi_reduction <maximumf>, %95, %cst_39 [1] : vector<2x8xf32> to vector<2xf32>
    %97 = vector.shape_cast %96 : vector<2xf32> to vector<2x1xf32>
    %98 = vector.broadcast %97 : vector<2x1xf32> to vector<2x8xf32>
    %99 = arith.subf %95, %98 : vector<2x8xf32>
    %100 = math.exp %99 : vector<2x8xf32>
    %cst_40 = arith.constant dense<0.000000e+00> : vector<2xf32>
    %101 = vector.multi_reduction <add>, %100, %cst_40 [1] : vector<2x8xf32> to vector<2xf32>
    %102 = vector.shape_cast %101 : vector<2xf32> to vector<2x1xf32>
    %103 = tpu.reciprocal %102 {approx = true} : vector<2x1xf32> -> vector<2x1xf32>
    %104 = vector.broadcast %103 : vector<2x1xf32> to vector<2x8xf32>
    %105 = arith.mulf %100, %104 : vector<2x8xf32>
    %106 = vector.shape_cast %105 : vector<2x8xf32> to vector<2x1x8xf32>
    "tpu.trace_start"() <{level = 10 : i32, message = "bqk,bkd->bqd"}> : () -> ()
    %cst_41 = arith.constant dense<0.000000e+00> : vector<2x1x32xf32>
    %107 = tpu.matmul %106, %79, %cst_41 {dimension_numbers = #tpu.dot_dimension_numbers<[2], [1], [1], [2], [0, 0, 0, 1, 1, 2], [0], [0]>} : vector<2x1x8xf32>, vector<2x8x32xf32>, vector<2x1x32xf32> -> vector<2x1x32xf32>
    "tpu.trace_stop"() : () -> ()
    %108 = vector.shape_cast %107 : vector<2x1x32xf32> to vector<2x32xf32>
    %c0_42 = arith.constant 0 : index
    %c0_43 = arith.constant 0 : index
    %109 = vector.load %arg9[%c0_42, %c0_43] : memref<2x32xf32, #tpu.memory_space<vmem>>, vector<2x32xf32>
    tpu.vector_store %arg9[%c0_42, %c0_43], %108 {strides = array<i32>} : memref<2x32xf32, #tpu.memory_space<vmem>>, vector<2x32xf32>,
    return
  }
  func.func @transform_0(%arg0: i32) -> (i32, i32, i32) {
    %c0_i32 = arith.constant 0 : i32
    %c0_i32_0 = arith.constant 0 : i32
    %c0_i32_1 = arith.constant 0 : i32
    return %arg0, %c0_i32, %c0_i32_0 : i32, i32, i32
  }
  func.func @transform_1(%arg0: i32) -> (i32, i32) {
    %c0_i32 = arith.constant 0 : i32
    %c0_i32_0 = arith.constant 0 : i32
    %c0_i32_1 = arith.constant 0 : i32
    return %c0_i32, %c0_i32_0 : i32, i32
  }
  func.func @transform_2(%arg0: i32) -> (i32, i32) {
    %c0_i32 = arith.constant 0 : i32
    %c0_i32_0 = arith.constant 0 : i32
    %c0_i32_1 = arith.constant 0 : i32
    return %c0_i32, %c0_i32_0 : i32, i32
  }
  func.func @transform_3(%arg0: i32) -> (i32, i32) {
    %c0_i32 = arith.constant 0 : i32
    %c0_i32_0 = arith.constant 0 : i32
    %c0_i32_1 = arith.constant 0 : i32
    return %c0_i32, %c0_i32_0 : i32, i32
  }
  func.func @transform_4(%arg0: i32) -> (i32, i32) {
    %c0_i32 = arith.constant 0 : i32
    %c0_i32_0 = arith.constant 0 : i32
    %c0_i32_1 = arith.constant 0 : i32
    return %c0_i32, %c0_i32_0 : i32, i32
  }
  func.func @transform_5(%arg0: i32) -> (i32, i32) {
    %c0_i32 = arith.constant 0 : i32
    %c0_i32_0 = arith.constant 0 : i32
    %c0_i32_1 = arith.constant 0 : i32
    return %c0_i32, %c0_i32_0 : i32, i32
  }
  func.func @transform_6(%arg0: i32) -> (i32, i32) {
    %c0_i32 = arith.constant 0 : i32
    %c0_i32_0 = arith.constant 0 : i32
    %c0_i32_1 = arith.constant 0 : i32
    return %c0_i32, %c0_i32_0 : i32, i32
  }
  func.func @transform_7(%arg0: i32) -> i32 {
    %c0_i32 = arith.constant 0 : i32
    %c0_i32_0 = arith.constant 0 : i32
    return %c0_i32 : i32
  }
  func.func @transform_8(%arg0: i32) -> (i32, i32) {
    %c0_i32 = arith.constant 0 : i32
    %c0_i32_0 = arith.constant 0 : i32
    return %arg0, %c0_i32 : i32, i32
  }
}

</mosaic_0001>

<bundles_post_ra>
// kernel: tpu_custom_call.1
= control target key start
LH: loop header
LB: loop body
LE: loop exit
PB: predicated region body
PF: predicated region fallthrough
CT: control target
= control target key end

     0   :  { %14 = vsyncpa [#allocation4], 0  ;;  %s2884_s0 = inlined_call_operand.hbm [shape: f32[2,8,32], index: 0, kind: input, shape index: {}]   ;;  %s2885_s1 = inlined_call_operand.hbm [shape: f32[32,32], index: 1, kind: input, shape index: {}]   ;;  %s2886_s2 = inlined_call_operand.hbm [shape: f32[32,32], index: 2, kind: input, shape index: {}]   ;;  %s2887_s3 = inlined_call_operand.hbm [shape: f32[32,32], index: 3, kind: input, shape index: {}]   ;;  %s2888_s4 = inlined_call_operand.hbm [shape: f32[32,32], index: 4, kind: input, shape index: {}]   ;;  %s2889_s5 = inlined_call_operand.vmem [shape: f32[1,32], index: 5, kind: input, shape index: {}]   ;;  %s2890_s6 = inlined_call_operand.vmem [shape: f32[1,32], index: 6, kind: input, shape index: {}]   ;;  %s2891_s7 = inlined_call_operand.<no memory space> [shape: f32[1], index: 7, kind: input, shape index: {}]   ;;  %s2892_s8 = inlined_call_operand.hbm [shape: f32[2,32], index: 8, kind: output, shape index: {}]  }
   0x1   :  { %15 = vsyncpa [#allocation7], 0 }
   0x2   :  { %16 = vsyncpa [#allocation10], 0 }
   0x3   :  { %17 = vsyncpa [#allocation5], 0  ;;  %s2528_s27 = smov [#allocation6]   ;;  %s2529_s29 = smov [#allocation9]  }
   0x4   :  { %s35_s28 = sshll.u32 %s2528_s27, 4  ;;  %s59_s30 = sshll.u32 %s2529_s29, 4  ;;  %s36_s28 = int_to_ptr.vmem [resolvable:$true] %s35_s28  ;;  %s2589_s30 = int_to_ptr.vmem [resolvable:$true] %s59_s30 }
   0x5   :  { %s2388_s11 = scalar_lea.hbm %s2885_s1, 512 }
   0x6   :  { %p2389_p0 = scmp.ne.s32.totalorder %s2885_s1, %s2388_s11  ;;  %p2392_p1 = scmp.lt.u32.totalorder %s2388_s11, %s2885_s1 }
   0x8   :  { %p2394_p2 = pnand %p2392_p1, %p2389_p0 }
   0xa   :  { %2397 = shalt.err (!%p2394_p2)
}
   0xb   :  { %s2398_s16 = scalar_lea.vmem %s36_s28, 512  ;;  %p2403_p4 = scmp.lt.s32.totalorder %s36_s28, %s36_s28 }
   0xc   :  { %p2399_p3 = scmp.ne.s32.totalorder %s36_s28, %s2398_s16  ;;  %p2404_p5 = scmp.lt.s32.totalorder %s2398_s16, %s2398_s16 }
   0xe   :  { %p2405_p6 = por %p2404_p5, %p2403_p4 }
  0x10   :  { %p2406_p7 = pnand %p2405_p6, %p2399_p3 }
  0x12   :  { %2409 = shalt.err (!%p2406_p7)
}
  0x13   :  { %s2530_s17 = smov 128   ;;  %s2531_s18 = smov 8  }
  0x14   :  { %41 = dma.hbm_to_vmem [thread:$0]  %s2885_s1, 512, %s36_s28, [#allocation7], %s2530_s17, %s2530_s17, %s2531_s18  }
  0x15   :  { %s2410_s23 = scalar_lea.hbm %s2887_s3, 512 }
  0x16   :  { %p2411_p8 = scmp.ne.s32.totalorder %s2887_s3, %s2410_s23  ;;  %p2414_p9 = scmp.lt.u32.totalorder %s2410_s23, %s2887_s3 }
  0x18   :  { %p2416_p10 = pnand %p2414_p9, %p2411_p8 }
  0x1a   :  { %2419 = shalt.err (!%p2416_p10)
}
  0x1b   :  { %s2420_s29 = scalar_lea.vmem %s2589_s30, 512  ;;  %p2425_p12 = scmp.lt.s32.totalorder %s2589_s30, %s2589_s30 }
  0x1c   :  { %p2421_p11 = scmp.ne.s32.totalorder %s2589_s30, %s2420_s29  ;;  %p2426_p13 = scmp.lt.s32.totalorder %s2420_s29, %s2420_s29 }
  0x1e   :  { %p2427_p0 = por %p2426_p13, %p2425_p12 }
  0x20   :  { %p2428_p1 = pnand %p2427_p0, %p2421_p11 }
  0x22   :  { %2431 = shalt.err (!%p2428_p1)
}
  0x23   :  { %65 = dma.hbm_to_vmem [thread:$0]  %s2887_s3, 512, %s2589_s30, [#allocation10], %s2530_s17, %s2530_s17, %s2531_s18  }
  0x24   :  { %s2532_s9 = smov [#allocation3]   ;;  %s2533_s11 = smov [#allocation8]  }
  0x25   :  { %s23_s10 = sshll.u32 %s2532_s9, 4  ;;  %s47_s12 = sshll.u32 %s2533_s11, 4  ;;  %s24_s10 = int_to_ptr.vmem [resolvable:$true] %s23_s10  ;;  %s2626_s12 = int_to_ptr.vmem [resolvable:$true] %s47_s12 }
  0x26   :  { %s2432_s15 = scalar_lea.hbm %s2884_s0, 256 }
  0x27   :  { %p2433_p2 = scmp.ne.s32.totalorder %s2884_s0, %s2432_s15  ;;  %p2436_p3 = scmp.lt.u32.totalorder %s2432_s15, %s2884_s0 }
  0x29   :  { %p2438_p4 = pnand %p2436_p3, %p2433_p2 }
  0x2b   :  { %2441 = shalt.err (!%p2438_p4)
}
  0x2c   :  { %s2442_s3 = scalar_lea.vmem %s24_s10, 256  ;;  %p2447_p6 = scmp.lt.s32.totalorder %s24_s10, %s24_s10 }
  0x2d   :  { %p2443_p5 = scmp.ne.s32.totalorder %s24_s10, %s2442_s3  ;;  %p2448_p7 = scmp.lt.s32.totalorder %s2442_s3, %s2442_s3 }
  0x2f   :  { %p2449_p8 = por %p2448_p7, %p2447_p6 }
  0x31   :  { %p2450_p9 = pnand %p2449_p8, %p2443_p5 }
  0x33   :  { %2453 = shalt.err (!%p2450_p9)
}
  0x34   :  { %29 = dma.hbm_to_vmem [thread:$0]  %s2884_s0, 256, %s24_s10, [#allocation4], %s2530_s17, %s2530_s17, %s2531_s18  }
  0x35   :  { %s2454_s25 = scalar_lea.hbm %s2886_s2, 512 }
  0x36   :  { %p2455_p10 = scmp.ne.s32.totalorder %s2886_s2, %s2454_s25  ;;  %p2458_p11 = scmp.lt.u32.totalorder %s2454_s25, %s2886_s2 }
  0x38   :  { %p2460_p12 = pnand %p2458_p11, %p2455_p10 }
  0x3a   :  { %2463 = shalt.err (!%p2460_p12)
}
  0x3b   :  { %s2464_s28 = scalar_lea.vmem %s2626_s12, 512  ;;  %p2469_p0 = scmp.lt.s32.totalorder %s2626_s12, %s2626_s12 }
  0x3c   :  { %p2465_p13 = scmp.ne.s32.totalorder %s2626_s12, %s2464_s28  ;;  %p2470_p1 = scmp.lt.s32.totalorder %s2464_s28, %s2464_s28 }
  0x3e   :  { %p2471_p2 = por %p2470_p1, %p2469_p0 }
  0x40   :  { %p2472_p3 = pnand %p2471_p2, %p2465_p13 }
  0x42   :  { %2475 = shalt.err (!%p2472_p3)
}
  0x43   :  { %53 = dma.hbm_to_vmem [thread:$0]  %s2886_s2, 512, %s2626_s12, [#allocation7], %s2530_s17, %s2530_s17, %s2531_s18  }
  0x44   :  { %s2534_s10 = smov [#allocation11]   ;;  %s2476_s15 = scalar_lea.hbm %s2888_s4, 512 }
  0x45   :  { %s71_s11 = sshll.u32 %s2534_s10, 4  ;;  %p2477_p4 = scmp.ne.s32.totalorder %s2888_s4, %s2476_s15  ;;  %s72_s11 = int_to_ptr.vmem [resolvable:$true] %s71_s11 }
  0x46   :  { %p2480_p5 = scmp.lt.u32.totalorder %s2476_s15, %s2888_s4 }
  0x48   :  { %p2482_p6 = pnand %p2480_p5, %p2477_p4 }
  0x4a   :  { %2485 = shalt.err (!%p2482_p6)
}
  0x4b   :  { %s2486_s3 = scalar_lea.vmem %s72_s11, 512  ;;  %p2491_p8 = scmp.lt.s32.totalorder %s72_s11, %s72_s11 }
  0x4c   :  { %p2487_p7 = scmp.ne.s32.totalorder %s72_s11, %s2486_s3  ;;  %p2492_p9 = scmp.lt.s32.totalorder %s2486_s3, %s2486_s3 }
  0x4e   :  { %p2493_p10 = por %p2492_p9, %p2491_p8 }
  0x50   :  { %p2494_p11 = pnand %p2493_p10, %p2487_p7 }
  0x52   :  { %2497 = shalt.err (!%p2494_p11)
}
  0x53   :  { %77 = dma.hbm_to_vmem [thread:$0]  %s2888_s4, 512, %s72_s11, [#allocation10], %s2530_s17, %s2530_s17, %s2531_s18  }
  0x54   :  { %2520 = dma.done.wait [#allocation4], 256  }
  0x55   :  { %2521 = vsyncadd [#allocation4], 4294967040 }
  0x56   :  { %2522 = dma.done.wait [#allocation7], 1024  }
  0x57   :  { %2523 = vsyncadd [#allocation7], 4294966272 }
  0x58   :  { %2524 = dma.done.wait [#allocation10], 1024  }
  0x59   :  { %2525 = vsyncadd [#allocation10], 4294966272  ;;  %v187_v0 = vld [vmem:[#allocation8] sm:$0xff]  ;;  %v188_v1 = vld [vmem:[#allocation8 + $0x8] sm:$0xff]  ;;  %vm105_vm0 = vcmask 261120   ;;  %v2535_v14 = vmov 0.0  }
  0x5a   :  { %v101_v2 = vld [vmem:[#allocation6] sm:$0xff]  ;;  %v2304_v3 = vpack.c.bf16 %v188_v1, %v187_v0  ;;  %v102_v4 = vld [vmem:[#allocation6 + $0x8] sm:$0xff]  ;;  %v189_v5 = vld [vmem:[#allocation8 + $0x10] sm:$0xff]  ;;  %vm2536_vm1 = vmmov 0   ;;  %vm345_vm2 = vcmask 64512   ;;  %s2537_s4 = smov 120  }
  0x5b   :  { %v190_v6 = vld [vmem:[#allocation8 + $0x18] sm:$0xff]  ;;  %v2296_v7 = vpack.c.bf16 %v102_v4, %v101_v2  ;;  %v103_v9 = vld [vmem:[#allocation6 + $0x10] sm:$0xff]  ;;  %v266_v19 = vld [vmem:[#allocation9] sm:$0xff]  ;;  %s2538_s17 = smov 112   ;;  %s2539_s30 = smov 104   ;;  %vm1695_vm3 = vcmask 195584  }
  0x5c   :  { %v2308_v8 = vpack.c.bf16 %v190_v6, %v189_v5  ;;  %v104_v10 = vld [vmem:[#allocation6 + $0x18] sm:$0xff]  ;;  %v99_v11 = vld [vmem:[#allocation3] sm:$0xff]  ;;  %2305 = vmatprep.subr.bf16.mxu1 %v2304_v3  ;;  %v267_v20 = vld [vmem:[#allocation9 + $0x8] sm:$0xff]  ;;  %s2540_s22 = smov 16   ;;  %vm1692_vm4 = vcmask 130048   ;;  %vm1823_vm5 = vcmask 1041409  }
  0x5d   :  { %v2300_v12 = vpack.c.bf16 %v104_v10, %v103_v9  ;;  %2181 = vmatprep.mubr.msk.f32.mxu1 %vm105_vm0, %v99_v11  ;;  %2307 = vmatpush3.bf16.msra.mxu1 %v2304_v3  ;;  %v100_v13 = vld [vmem:[#allocation3 + $0x8] sm:$0xff]  ;;  %v268_v21 = vld [vmem:[#allocation9 + $0x10] sm:$0xff]  ;;  %v2312_v22 = vpack.c.bf16 %v267_v20, %v266_v19  ;;  %vm1826_vm6 = vcmask 58368   ;;  %vm2047_vm7 = vcmask 254976  }
  0x5e   :  { %2297 = vmatprep.subr.bf16.mxu0 %v2296_v7  ;;  %2309 = vmatprep.subr.bf16.mxu1 %v2308_v8  ;;  %v269_v23 = vld [vmem:[#allocation9 + $0x18] sm:$0xff] }
  0x5f   :  { %2299 = vmatpush3.bf16.msra.mxu0 %v2296_v7  ;;  %2170 = vmatprep.mubr.msk.f32.mxu0 %vm105_vm0, %v99_v11  ;;  %v2316_v24 = vpack.c.bf16 %v269_v23, %v268_v21 }
  0x60   :  { %2301 = vmatprep.subr.bf16.mxu0 %v2300_v12 }
  0x61   :  { %2311 = vmatpush3.bf16.msra.mxu1 %v2308_v8 }
  0x62   :  { %2195 = vmatprep.subr.mxu1 %v2535_v14 }
  0x63   :  { %2303 = vmatpush3.bf16.msra.mxu0 %v2300_v12 }
  0x64   :  { %2182 = vmatmul.mubr.msk.f32.vlgmr.msra.gmra.mrb[0].mxu1 %vm105_vm0, %v100_v13  ;;  %2313 = vmatprep.subr.bf16.mxu0 %v2312_v22 }
  0x65   :  { %2197 = vmatprep.mubr.msk.f32.mxu1 %vm2536_vm1, %v2535_v14 }
  0x66   :  { %2171 = vmatmul.mubr.msk.f32.vlgmr.msra.gmra.mrb[0].mxu0 %vm105_vm0, %v100_v13 }
  0x67   :  { %2192 = vmatprep.mubr.msk.f32.mxu0 %vm105_vm0, %v99_v11  ;;  %2315 = vmatpush3.bf16.msra.mxu0 %v2312_v22 }
  0x68   :  { %2317 = vmatprep.subr.bf16.mxu0 %v2316_v24 }
  0x6b   :  { %2319 = vmatpush3.bf16.msra.mxu0 %v2316_v24 }
  0x6c   :  { %2205 = vmatprep.subr.mxu0 %v2535_v14 }
  0x6e   :  { %2193 = vmatmul.mubr.msk.f32.vlgmr.msra.gmra.mrb[2].mxu0 %vm105_vm0, %v100_v13 }
  0x6f   :  { %2207 = vmatprep.mubr.msk.f32.mxu0 %vm2536_vm1, %v2535_v14 }
 0x137   :  { %v2686_v15 = vpop.f32.mrb[0].mxu1 }
 0x138   :  { %748 = vrot.lane.b32.xlu1 %v2686_v15, %s2537_s4  ;;  %v2690_v16 = vpop.f32.mrb[1].mxu1 }
 0x139   :  { %v2692_v17 = vpop.f32.mrb[0].mxu0  ;;  %2196 = vmatpush3.xpose.msk.msra.mxu1 %vm345_vm2, %v2690_v16 }
 0x13a   :  { %v2696_v18 = vpop.f32.mrb[1].mxu0  ;;  %2200 = vmatprep.subr.mxu1 %v2535_v14 }
 0x13c   :  { %668 = vrot.lane.b32.xlu1 %v2696_v18, %s2537_s4  ;;  %2198 = vmatmul.mubr.msk.f32.vlgmr.msra.gmra.mrb[2].mxu1 %vm345_vm2, %v2696_v18 }
 0x13d   :  { %2201 = vmatpush3.xpose.msk.msra.mxu1 %vm345_vm2, %v2686_v15  ;;  %2202 = vmatprep.mubr.msk.f32.mxu1 %vm2536_vm1, %v2535_v14 }
 0x13e   :  { %2210 = vmatprep.subr.mxu1 %v2535_v14 }
 0x140   :  { %2203 = vmatmul.mubr.msk.f32.vlgmr.msra.gmra.mrb[4].mxu1 %vm345_vm2, %v2692_v17 }
 0x141   :  { %2212 = vmatprep.mubr.msk.f32.mxu1 %vm2536_vm1, %v2535_v14  ;;  %v2722_v43 = vpop.f32.mrb[2].mxu0 }
 0x142   :  { %v2724_v44 = vpop.f32.mrb[3].mxu0  ;;  %2211 = vmatpush3.msra.mxu1 %v2722_v43 }
 0x143   :  { %2206 = vmatpush3.msra.mxu0 %v2724_v44  ;;  %2220 = vmatprep.subr.mxu1 %v2535_v14 }
 0x144   :  { %2215 = vmatprep.subr.mxu0 %v2535_v14 }
 0x1aa   :  { %v749_v45 = vpop.permute.xlu1 %748 }
 0x1ae   :  { %v669_v46 = vpop.permute.xlu1 %668 }
 0x20f   :  { %v418_v25 = vpop.f32.mrb[2].mxu1 }
 0x210   :  { %v498_v26 = vmul.f32 0.35355338, %v418_v25  ;;  %v2199_v27 = vpop.f32.mrb[3].mxu1 }
 0x212   :  { %v500_v28 = vsel %vm345_vm2, %v498_v26, -inf }
 0x213   :  { %501 = vmax.xlane.f32.xlu0 %v500_v28  ;;  %v494_v29 = vpop.f32.mrb[4].mxu1 }
 0x214   :  { %v499_v30 = vmul.f32 0.35355338, %v494_v29  ;;  %v2204_v31 = vpop.f32.mrb[5].mxu1 }
 0x216   :  { %v503_v32 = vsel %vm345_vm2, %v499_v30, -inf }
 0x217   :  { %504 = vmax.xlane.f32.xlu0 %v503_v32 }
 0x22d   :  { %670 = vrot.lane.b32.xlu0 %v2690_v16, %s2537_s4 }
 0x2a0   :  { %v502_v33 = vpop.xlane.xlu0 %501 }
 0x2a1   :  { %v506_v34 = vsub.f32 %v498_v26, %v502_v33 }
 0x2a3   :  { %v508_v35 = vmul.f32 1.442695, %v506_v34 }
 0x2a4   :  { %v505_v36 = vpop.xlane.xlu0 %504 }
 0x2a5   :  { %2346 = vpow2.f32 %v508_v35  ;;  %v507_v37 = vsub.f32 %v499_v30, %v505_v36 }
 0x2a7   :  { %v510_v38 = vmul.f32 1.442695, %v507_v37 }
 0x2a8   :  { %v671_v51 = vpop.permute.xlu0 %670 }
 0x2a9   :  { %2348 = vpow2.f32 %v510_v38 }
 0x2af   :  { %v2347_v39 = vpop.eup %2346 }
 0x2b0   :  { %v512_v40 = vsel %vm345_vm2, %v2347_v39, 0.0 }
 0x2b1   :  { %513 = vadd.xlane.f32.xlu1 %v512_v40 }
 0x2b3   :  { %v2349_v41 = vpop.eup %2348 }
 0x2b4   :  { %v515_v42 = vsel %vm345_vm2, %v2349_v41, 0.0 }
 0x2b5   :  { %516 = vadd.xlane.f32.xlu1 %v515_v42 }
 0x2c6   :  { %746 = vrot.lane.b32.xlu1 %v2692_v17, %s2537_s4 }
 0x33e   :  { %v514_v47 = vpop.xlane.xlu1 %513 }
 0x33f   :  { %2350 = vrcp.f32 %v514_v47 }
 0x342   :  { %v517_v48 = vpop.xlane.xlu1 %516 }
 0x343   :  { %2352 = vrcp.f32 %v517_v48 }
 0x346   :  { %v747_v54 = vpop.permute.xlu1 %746 }
 0x349   :  { %v2351_v49 = vpop.eup %2350 }
 0x34a   :  { %v520_v50 = vmul.f32 %v2351_v49, %v2347_v39 }
 0x34c   :  { %2208 = vmatmul.mubr.msk.f32.vlgmr.msra.gmra.mrb[4].mxu0 %vm345_vm2, %v520_v50 }
 0x34d   :  { %v2353_v52 = vpop.eup %2352  ;;  %2216 = vmatpush3.xpose.msk.msra.mxu0 %vm345_vm2, %v671_v51  ;;  %2217 = vmatprep.mubr.msk.f32.mxu0 %vm2536_vm1, %v2535_v14 }
 0x34e   :  { %v521_v53 = vmul.f32 %v2353_v52, %v2349_v41  ;;  %2225 = vmatprep.subr.mxu0 %v2535_v14 }
 0x350   :  { %2213 = vmatmul.mubr.msk.f32.vlgmr.msra.gmra.mrb[6].mxu1 %vm345_vm2, %v521_v53  ;;  %2218 = vmatmul.mubr.msk.f32.vlgmr.msra.gmra.mrb[6].mxu0 %vm345_vm2, %v669_v46 }
 0x351   :  { %2221 = vmatpush3.xpose.msk.msra.mxu1 %vm345_vm2, %v749_v45  ;;  %2222 = vmatprep.mubr.msk.f32.mxu1 %vm2536_vm1, %v2535_v14 }
 0x352   :  { %2230 = vmatprep.subr.mxu1 %v2535_v14  ;;  %2227 = vmatprep.mubr.msk.f32.mxu0 %vm2536_vm1, %v2535_v14 }
 0x354   :  { %2223 = vmatmul.mubr.msk.f32.vlgmr.msra.gmra.mrb[8].mxu1 %vm345_vm2, %v747_v54 }
 0x355   :  { %2232 = vmatprep.mubr.msk.f32.mxu1 %vm2536_vm1, %v2535_v14 }
 0x41f   :  { %v2748_v55 = vpop.f32.mrb[4].mxu0 }
 0x420   :  { %v2209_v56 = vpop.f32.mrb[5].mxu0 }
 0x423   :  { %v2750_v57 = vpop.f32.mrb[6].mxu1  ;;  %v742_v58 = vpop.f32.mrb[6].mxu0 }
 0x424   :  { %v824_v59 = vmul.f32 0.35355338, %v742_v58  ;;  %v2214_v60 = vpop.f32.mrb[7].mxu1  ;;  %v2219_v61 = vpop.f32.mrb[7].mxu0 }
 0x426   :  { %v826_v62 = vsel %vm345_vm2, %v824_v59, -inf }
 0x427   :  { %v820_v63 = vpop.f32.mrb[8].mxu1  ;;  %827 = vmax.xlane.f32.xlu0 %v826_v62 }
 0x428   :  { %v825_v0 = vmul.f32 0.35355338, %v820_v63  ;;  %v2224_v1 = vpop.f32.mrb[9].mxu1 }
 0x42a   :  { %v829_v2 = vsel %vm345_vm2, %v825_v0, -inf }
 0x42b   :  { %830 = vmax.xlane.f32.xlu1 %v829_v2 }
 0x43c   :  { %926 = vrot.lane.b32.xlu1 %v2722_v43, %s2537_s4 }
 0x43d   :  { %849 = vrot.lane.b32.xlu0 %v2724_v44, %s2537_s4 }
 0x440   :  { %1004 = vrot.lane.b32.xlu1 %v2690_v16, %s2538_s17 }
 0x444   :  { %1082 = vrot.lane.b32.xlu1 %v2686_v15, %s2538_s17 }
 0x448   :  { %1080 = vrot.lane.b32.xlu1 %v2692_v17, %s2538_s17 }
 0x4b4   :  { %v828_v3 = vpop.xlane.xlu0 %827 }
 0x4b5   :  { %v832_v4 = vsub.f32 %v824_v59, %v828_v3 }
 0x4b7   :  { %v834_v5 = vmul.f32 1.442695, %v832_v4 }
 0x4b8   :  { %v831_v6 = vpop.xlane.xlu1 %830  ;;  %v850_v7 = vpop.permute.xlu0 %849 }
 0x4b9   :  { %2354 = vpow2.f32 %v834_v5  ;;  %v833_v8 = vsub.f32 %v825_v0, %v831_v6  ;;  %2226 = vmatpush3.msra.mxu0 %v850_v7 }
 0x4ba   :  { %2235 = vmatprep.subr.mxu0 %v2535_v14 }
 0x4bb   :  { %v836_v9 = vmul.f32 1.442695, %v833_v8 }
 0x4bc   :  { %v927_v10 = vpop.permute.xlu1 %926 }
 0x4bd   :  { %2356 = vpow2.f32 %v836_v9  ;;  %2231 = vmatpush3.msra.mxu1 %v927_v10 }
 0x4be   :  { %2240 = vmatprep.subr.mxu1 %v2535_v14 }
 0x4c0   :  { %v1005_v22 = vpop.permute.xlu1 %1004 }
 0x4c3   :  { %v2355_v11 = vpop.eup %2354 }
 0x4c4   :  { %v838_v12 = vsel %vm345_vm2, %v2355_v11, 0.0  ;;  %v1083_v26 = vpop.permute.xlu1 %1082 }
 0x4c5   :  { %839 = vadd.xlane.f32.xlu0 %v838_v12 }
 0x4c7   :  { %v2357_v13 = vpop.eup %2356 }
 0x4c8   :  { %v841_v19 = vsel %vm345_vm2, %v2357_v13, 0.0  ;;  %v1081_v29 = vpop.permute.xlu1 %1080 }
 0x4c9   :  { %842 = vadd.xlane.f32.xlu0 %v841_v19 }
 0x4df   :  { %1002 = vrot.lane.b32.xlu0 %v2696_v18, %s2538_s17 }
 0x552   :  { %v840_v20 = vpop.xlane.xlu0 %839 }
 0x553   :  { %2358 = vrcp.f32 %v840_v20 }
 0x556   :  { %v843_v21 = vpop.xlane.xlu0 %842 }
 0x557   :  { %2360 = vrcp.f32 %v843_v21 }
 0x55a   :  { %v1003_v28 = vpop.permute.xlu0 %1002 }
 0x55d   :  { %v2359_v23 = vpop.eup %2358 }
 0x55e   :  { %v846_v24 = vmul.f32 %v2359_v23, %v2355_v11 }
 0x560   :  { %2228 = vmatmul.mubr.msk.f32.vlgmr.msra.gmra.mrb[8].mxu0 %vm345_vm2, %v846_v24 }
 0x561   :  { %v2361_v25 = vpop.eup %2360  ;;  %2236 = vmatpush3.xpose.msk.msra.mxu0 %vm345_vm2, %v1005_v22  ;;  %2237 = vmatprep.mubr.msk.f32.mxu0 %vm2536_vm1, %v2535_v14 }
 0x562   :  { %v847_v27 = vmul.f32 %v2361_v25, %v2357_v13  ;;  %2245 = vmatprep.subr.mxu0 %v2535_v14 }
 0x564   :  { %2233 = vmatmul.mubr.msk.f32.vlgmr.msra.gmra.mrb[10].mxu1 %vm345_vm2, %v847_v27  ;;  %2238 = vmatmul.mubr.msk.f32.vlgmr.msra.gmra.mrb[10].mxu0 %vm345_vm2, %v1003_v28 }
 0x565   :  { %2241 = vmatpush3.xpose.msk.msra.mxu1 %vm345_vm2, %v1083_v26  ;;  %2242 = vmatprep.mubr.msk.f32.mxu1 %vm2536_vm1, %v2535_v14 }
 0x566   :  { %2250 = vmatprep.subr.mxu1 %v2535_v14  ;;  %2247 = vmatprep.mubr.msk.f32.mxu0 %vm2536_vm1, %v2535_v14 }
 0x568   :  { %2243 = vmatmul.mubr.msk.f32.vlgmr.msra.gmra.mrb[12].mxu1 %vm345_vm2, %v1081_v29 }
 0x569   :  { %2252 = vmatprep.mubr.msk.f32.mxu1 %vm2536_vm1, %v2535_v14 }
 0x633   :  { %v2786_v30 = vpop.f32.mrb[8].mxu0 }
 0x634   :  { %v2229_v31 = vpop.f32.mrb[9].mxu0 }
 0x637   :  { %v2788_v32 = vpop.f32.mrb[10].mxu1  ;;  %v1076_v33 = vpop.f32.mrb[10].mxu0 }
 0x638   :  { %v1158_v34 = vmul.f32 0.35355338, %v1076_v33  ;;  %v2234_v35 = vpop.f32.mrb[11].mxu1  ;;  %v2239_v36 = vpop.f32.mrb[11].mxu0 }
 0x639   :  { %v1700_v36 = vld [vmem:[#allocation11 + $0x10] sm:$0xff] }
 0x63a   :  { %v1160_v37 = vsel %vm345_vm2, %v1158_v34, -inf }
 0x63b   :  { %v1154_v38 = vpop.f32.mrb[12].mxu1  ;;  %1161 = vmax.xlane.f32.xlu0 %v1160_v37  ;;  %v1701_v37 = vld [vmem:[#allocation11 + $0x18] sm:$0xff] }
 0x63c   :  { %v1159_v39 = vmul.f32 0.35355338, %v1154_v38  ;;  %v2244_v40 = vpop.f32.mrb[13].mxu1  ;;  %v2324_v38 = vpack.c.bf16 %v1701_v37, %v1700_v36 }
 0x63e   :  { %v1163_v41 = vsel %vm345_vm2, %v1159_v39, -inf }
 0x63f   :  { %1164 = vmax.xlane.f32.xlu1 %v1163_v41 }
 0x650   :  { %1258 = vrot.lane.b32.xlu1 %v2722_v43, %s2538_s17 }
 0x651   :  { %1182 = vrot.lane.b32.xlu0 %v2724_v44, %s2538_s17 }
 0x654   :  { %1336 = vrot.lane.b32.xlu1 %v2690_v16, %s2539_s30 }
 0x658   :  { %1414 = vrot.lane.b32.xlu1 %v2686_v15, %s2539_s30 }
 0x65c   :  { %1412 = vrot.lane.b32.xlu1 %v2692_v17, %s2539_s30 }
 0x6c8   :  { %v1162_v42 = vpop.xlane.xlu0 %1161 }
 0x6c9   :  { %v1166_v45 = vsub.f32 %v1158_v34, %v1162_v42  ;;  %v1698_v34 = vld [vmem:[#allocation11] sm:$0xff] }
 0x6cb   :  { %v1168_v46 = vmul.f32 1.442695, %v1166_v45 }
 0x6cc   :  { %v1165_v47 = vpop.xlane.xlu1 %1164  ;;  %v1183_v48 = vpop.permute.xlu0 %1182 }
 0x6cd   :  { %2362 = vpow2.f32 %v1168_v46  ;;  %v1167_v49 = vsub.f32 %v1159_v39, %v1165_v47  ;;  %2246 = vmatpush3.msra.mxu0 %v1183_v48 }
 0x6ce   :  { %2255 = vmatprep.subr.mxu0 %v2535_v14 }
 0x6cf   :  { %v1170_v50 = vmul.f32 1.442695, %v1167_v49 }
 0x6d0   :  { %v1259_v51 = vpop.permute.xlu1 %1258 }
 0x6d1   :  { %2364 = vpow2.f32 %v1170_v50  ;;  %2251 = vmatpush3.msra.mxu1 %v1259_v51 }
 0x6d2   :  { %2260 = vmatprep.subr.mxu1 %v2535_v14 }
 0x6d4   :  { %v1337_v56 = vpop.permute.xlu1 %1336 }
 0x6d7   :  { %v2363_v15 = vpop.eup %2362 }
 0x6d8   :  { %v1172_v16 = vsel %vm345_vm2, %v2363_v15, 0.0  ;;  %v1415_v61 = vpop.permute.xlu1 %1414 }
 0x6d9   :  { %1173 = vadd.xlane.f32.xlu0 %v1172_v16 }
 0x6db   :  { %v2365_v17 = vpop.eup %2364 }
 0x6dc   :  { %v1175_v52 = vsel %vm345_vm2, %v2365_v17, 0.0  ;;  %v1413_v63 = vpop.permute.xlu1 %1412 }
 0x6dd   :  { %1176 = vadd.xlane.f32.xlu0 %v1175_v52 }
 0x6f3   :  { %1334 = vrot.lane.b32.xlu0 %v2696_v18, %s2539_s30 }
 0x766   :  { %v1174_v53 = vpop.xlane.xlu0 %1173 }
 0x767   :  { %2366 = vrcp.f32 %v1174_v53 }
 0x76a   :  { %v1177_v54 = vpop.xlane.xlu0 %1176 }
 0x76b   :  { %2368 = vrcp.f32 %v1177_v54 }
 0x76e   :  { %v1335_v18 = vpop.permute.xlu0 %1334 }
 0x771   :  { %v2367_v58 = vpop.eup %2366 }
 0x772   :  { %v1180_v59 = vmul.f32 %v2367_v58, %v2363_v15 }
 0x774   :  { %2248 = vmatmul.mubr.msk.f32.vlgmr.msra.gmra.mrb[12].mxu0 %vm345_vm2, %v1180_v59 }
 0x775   :  { %v2369_v60 = vpop.eup %2368  ;;  %2256 = vmatpush3.xpose.msk.msra.mxu0 %vm345_vm2, %v1337_v56  ;;  %2257 = vmatprep.mubr.msk.f32.mxu0 %vm2536_vm1, %v2535_v14 }
 0x776   :  { %v1181_v62 = vmul.f32 %v2369_v60, %v2365_v17  ;;  %2265 = vmatprep.subr.mxu0 %v2535_v14 }
 0x778   :  { %2253 = vmatmul.mubr.msk.f32.vlgmr.msra.gmra.mrb[14].mxu1 %vm345_vm2, %v1181_v62  ;;  %2258 = vmatmul.mubr.msk.f32.vlgmr.msra.gmra.mrb[14].mxu0 %vm345_vm2, %v1335_v18 }
 0x779   :  { %2261 = vmatpush3.xpose.msk.msra.mxu1 %vm345_vm2, %v1415_v61  ;;  %2262 = vmatprep.mubr.msk.f32.mxu1 %vm2536_vm1, %v2535_v14 }
 0x77a   :  { %2270 = vmatprep.subr.mxu1 %v2535_v14  ;;  %2267 = vmatprep.mubr.msk.f32.mxu0 %vm2536_vm1, %v2535_v14 }
 0x77c   :  { %2263 = vmatmul.mubr.msk.f32.vlgmr.msra.gmra.mrb[16].mxu1 %vm345_vm2, %v1413_v63 }
 0x77d   :  { %2272 = vmatprep.mubr.msk.f32.mxu1 %vm2536_vm1, %v2535_v14 }
 0x847   :  { %v1254_v0 = vpop.f32.mrb[12].mxu0 }
 0x848   :  { %v2249_v1 = vpop.f32.mrb[13].mxu0 }
 0x849   :  { %v1813_v1 = vlaneseq }
 0x84b   :  { %v1330_v2 = vpop.f32.mrb[14].mxu1  ;;  %v1408_v3 = vpop.f32.mrb[14].mxu0 }
 0x84c   :  { %v1490_v4 = vmul.f32 0.35355338, %v1408_v3  ;;  %v2254_v5 = vpop.f32.mrb[15].mxu1  ;;  %v2259_v6 = vpop.f32.mrb[15].mxu0  ;;  %v1816_v3 = vshrl.u32 %v1813_v1, 7 }
 0x84e   :  { %v1492_v7 = vsel %vm345_vm2, %v1490_v4, -inf }
 0x84f   :  { %v1486_v8 = vpop.f32.mrb[16].mxu1  ;;  %1493 = vmax.xlane.f32.xlu0 %v1492_v7 }
 0x850   :  { %v1491_v9 = vmul.f32 0.35355338, %v1486_v8  ;;  %v2264_v10 = vpop.f32.mrb[17].mxu1 }
 0x852   :  { %v1495_v11 = vsel %vm345_vm2, %v1491_v9, -inf }
 0x853   :  { %1496 = vmax.xlane.f32.xlu1 %v1495_v11 }
 0x864   :  { %1590 = vrot.lane.b32.xlu1 %v2722_v43, %s2539_s30 }
 0x868   :  { %1668 = vrot.lane.b32.xlu1 %v2786_v30, %s2531_s18 }
 0x86c   :  { %1670 = vrot.lane.b32.xlu1 %v2788_v32, %s2531_s18  ;;  %s2541_s18 = smov 24  }
 0x870   :  { %1678 = vrot.lane.b32.xlu1 %v1330_v2, %s2540_s22  ;;  %v1814_v2 = vand.u32 127, %v1813_v1 }
 0x872   :  { %v1817_v5 = vsub.s32 %v1814_v2, %v1816_v3 }
 0x8dc   :  { %v1494_v12 = vpop.xlane.xlu0 %1493 }
 0x8dd   :  { %v1498_v13 = vsub.f32 %v1490_v4, %v1494_v12  ;;  %v1808_v4 = vstv %s2891_s7 }
 0x8df   :  { %v1500_v19 = vmul.f32 1.442695, %v1498_v13 }
 0x8e0   :  { %v1497_v20 = vpop.xlane.xlu1 %1496 }
 0x8e1   :  { %2370 = vpow2.f32 %v1500_v19  ;;  %v1499_v21 = vsub.f32 %v1491_v9, %v1497_v20  ;;  %v2542_v19 = vmov 0   ;;  %v1833_v20 = vsub.s32 0, %v1816_v3 }
 0x8e2   :  { %2345 = vset.pattern.permute.xlu1 %v2542_v19  ;;  %2344 = vset.pattern.permute.xlu0 %v2542_v19 }
 0x8e3   :  { %v1502_v22 = vmul.f32 1.442695, %v1499_v21  ;;  %v1837_v21 = vsub.s32 1, %v1816_v3 }
 0x8e4   :  { %v1591_v23 = vpop.permute.xlu1 %1590 }
 0x8e5   :  { %2372 = vpow2.f32 %v1502_v22  ;;  %2271 = vmatpush3.msra.mxu1 %v1591_v23 }
 0x8e6   :  { %2286 = vmatprep.subr.mxu1 %v2535_v14 }
 0x8e8   :  { %v1669_v45 = vpop.permute.xlu1 %1668 }
 0x8e9   :  { %v1690_v48 = vsel %vm345_vm2, %v2748_v55, %v1669_v45  ;;  %v2096_v55 = vld [vmem:[%s2889_s5] ss:$0 sm:$0xff] }
 0x8eb   :  { %v2371_v43 = vpop.eup %2370 }
 0x8ec   :  { %v1504_v24 = vsel %vm345_vm2, %v2371_v43, 0.0  ;;  %v1671_v46 = vpop.permute.xlu1 %1670 }
 0x8ed   :  { %1505 = vadd.xlane.f32.xlu0 %v1504_v24  ;;  %v1691_v16 = vsel %vm345_vm2, %v2750_v57, %v1671_v46  ;;  %v2099_v57 = vld [vmem:[%s2890_s6] ss:$0 sm:$0xff]  ;;  %s2543_s6 = smov [#allocation12]  }
 0x8ee   :  { %s2055_s7 = sshll.u32 %s2543_s6, 4  ;;  %s2056_s7 = int_to_ptr.vmem [resolvable:$true] %s2055_s7 }
 0x8ef   :  { %v2373_v25 = vpop.eup %2372  ;;  %s2498_s29 = scalar_lea.vmem %s2056_s7, 32  ;;  %p2503_p13 = scmp.lt.s32.totalorder %s2056_s7, %s2056_s7 }
 0x8f0   :  { %v1507_v26 = vsel %vm345_vm2, %v2373_v25, 0.0  ;;  %v1679_v49 = vpop.permute.xlu1 %1678  ;;  %p2499_p12 = scmp.ne.s32.totalorder %s2056_s7, %s2498_s29  ;;  %p2504_p0 = scmp.lt.s32.totalorder %s2498_s29, %s2498_s29 }
 0x8f1   :  { %1508 = vadd.xlane.f32.xlu0 %v1507_v26  ;;  %v1694_v17 = vsel %vm1692_vm4, %v1691_v16, %v1679_v49 }
 0x8f2   :  { %p2505_p1 = por %p2504_p0, %p2503_p13 }
 0x8f4   :  { %p2506_p2 = pnand %p2505_p1, %p2499_p12 }
 0x907   :  { %1514 = vrot.lane.b32.xlu0 %v2724_v44, %s2539_s30  ;;  %v1699_v44 = vld [vmem:[#allocation11 + $0x8] sm:$0xff] }
 0x908   :  { %v2320_v35 = vpack.c.bf16 %v1699_v44, %v1698_v34 }
 0x90b   :  { %1676 = vrot.lane.b32.xlu0 %v1254_v0, %s2540_s22 }
 0x97a   :  { %v1506_v27 = vpop.xlane.xlu0 %1505 }
 0x97b   :  { %2374 = vrcp.f32 %v1506_v27 }
 0x97e   :  { %v1509_v28 = vpop.xlane.xlu0 %1508 }
 0x97f   :  { %2376 = vrcp.f32 %v1509_v28 }
 0x982   :  { %v1515_v29 = vpop.permute.xlu0 %1514 }
 0x983   :  { %2266 = vmatpush3.msra.mxu0 %v1515_v29 }
 0x984   :  { %2321 = vmatprep.subr.bf16.mxu0 %v2320_v35 }
 0x985   :  { %v2375_v30 = vpop.eup %2374 }
 0x986   :  { %v1512_v31 = vmul.f32 %v2375_v30, %v2371_v43  ;;  %v1677_v47 = vpop.permute.xlu0 %1676 }
 0x987   :  { %v1693_v50 = vsel %vm1692_vm4, %v1690_v48, %v1677_v47 }
 0x988   :  { %2268 = vmatmul.mubr.msk.f32.vlgmr.msra.gmra.mrb[16].mxu0 %vm345_vm2, %v1512_v31 }
 0x989   :  { %v2377_v32 = vpop.eup %2376  ;;  %2323 = vmatpush3.bf16.msra.mxu0 %v2320_v35 }
 0x98a   :  { %v1513_v33 = vmul.f32 %v2377_v32, %v2373_v25  ;;  %2325 = vmatprep.subr.bf16.mxu0 %v2324_v38 }
 0x98c   :  { %2273 = vmatmul.mubr.msk.f32.vlgmr.msra.gmra.mrb[18].mxu1 %vm345_vm2, %v1513_v33 }
 0x98d   :  { %2288 = vmatprep.mubr.msk.f32.mxu1 %vm2536_vm1, %v2535_v14  ;;  %2327 = vmatpush3.bf16.msra.mxu0 %v2324_v38 }
 0xa5b   :  { %v1586_v39 = vpop.f32.mrb[16].mxu0 }
 0xa5c   :  { %1684 = vrot.lane.b32.xlu0 %v1586_v39, %s2541_s18  ;;  %v2269_v40 = vpop.f32.mrb[17].mxu0 }
 0xa5f   :  { %v1662_v41 = vpop.f32.mrb[18].mxu1 }
 0xa60   :  { %1686 = vrot.lane.b32.xlu1 %v1662_v41, %s2541_s18  ;;  %v2274_v42 = vpop.f32.mrb[19].mxu1 }
 0xace   :  { %v1685_v51 = vpop.permute.xlu0 %1684 }
 0xacf   :  { %v1696_v15 = vsel %vm1695_vm3, %v1693_v50, %v1685_v51 }
 0xad0   :  { %2283 = vmatprep.mubr.msk.f32.mxu0 %vm105_vm0, %v1696_v15  ;;  %2287 = vmatpush3.msra.mxu1 %v1696_v15 }
 0xad1   :  { %2291 = vmatprep.subr.mxu1 %v2535_v14 }
 0xad2   :  { %v1687_v52 = vpop.permute.xlu1 %1686 }
 0xad3   :  { %v2847_v53 = vsel %vm1695_vm3, %v1694_v17, %v1687_v52 }
 0xad4   :  { %2284 = vmatmul.mubr.msk.f32.vlgmr.msra.gmra.mrb[18].mxu0 %vm105_vm0, %v2847_v53 }
 0xba7   :  { %v2285_v54 = vpop.f32.mrb[18].mxu0 }
 0xba8   :  { %v1787_v56 = vadd.f32 %v2285_v54, %v2096_v55  ;;  %v1781_v58 = vpop.f32.mrb[19].mxu0 }
 0xba9   :  { %v1782_v59 = vadd.f32 %v2096_v55, %v1781_v58 }
 0xbaa   :  { %2378 = vtanh.f32 %v1787_v56 }
 0xbab   :  { %2380 = vtanh.f32 %v1782_v59 }
 0xbb4   :  { %v2379_v60 = vpop.eup %2378 }
 0xbb5   :  { %v2381_v61 = vpop.eup %2380  ;;  %v1800_v62 = vmul.f32 %v2379_v60, %v2099_v57 }
 0xbb6   :  { %v1799_v18 = vmul.f32 %v2381_v61, %v2099_v57 }
 0xbb7   :  { %v1804_v63 = vsel %vm105_vm0, %v1800_v62, 0.0 }
 0xbb8   :  { %1805 = vadd.xlane.f32.xlu1 %v1804_v63  ;;  %v1801_v0 = vsel %vm105_vm0, %v1799_v18, 0.0 }
 0xbb9   :  { %1802 = vadd.xlane.f32.xlu0 %v1801_v0 }
 0xc45   :  { %v1806_v6 = vpop.xlane.xlu1 %1805 }
 0xc46   :  { %v1810_v7 = vadd.f32 %v1808_v4, %v1806_v6  ;;  %v1803_v8 = vpop.xlane.xlu0 %1802 }
 0xc47   :  { %v1809_v9 = vadd.f32 %v1808_v4, %v1803_v8 }
 0xc48   :  { %v1822_v10 = vrot.slane %v1810_v7, %v1817_v5 }
 0xc49   :  { %v1818_v11 = vrot.slane %v1809_v9, %v1817_v5 }
 0xc4b   :  { %v1824_v12 = vsel %vm1823_vm5, %v1822_v10, %v1818_v11 }
 0xc4c   :  { %v1827_v13 = vsel %vm1826_vm6, %v1824_v12, -inf }
 0xc4d   :  { %1828 = vmax.xlane.f32.xlu0 %v1827_v13 }
 0xcda   :  { %v1829_v22 = vpop.xlane.xlu0 %1828 }
 0xcdb   :  { %v1834_v23 = vrot.slane %v1829_v22, %v1833_v20  ;;  %v1838_v43 = vrot.slane %v1829_v22, %v1837_v21 }
 0xcdd   :  { %v1841_v24 = vsub.f32 %v1809_v9, %v1834_v23  ;;  %v1842_v25 = vsub.f32 %v1810_v7, %v1838_v43 }
 0xcdf   :  { %v1843_v26 = vmul.f32 1.442695, %v1841_v24  ;;  %v1845_v27 = vmul.f32 1.442695, %v1842_v25 }
 0xce1   :  { %2382 = vpow2.f32 %v1843_v26 }
 0xce2   :  { %2384 = vpow2.f32 %v1845_v27 }
 0xceb   :  { %v2383_v28 = vpop.eup %2382 }
 0xcec   :  { %v2385_v29 = vpop.eup %2384  ;;  %1850 = vperm.xlu0 %2344, %v2383_v28  }
 0xced   :  { %1853 = vperm.xlu1 %2345, %v2385_v29  }
 0xd6b   :  { %v1851_v30 = vpop.permute.xlu0 %1850 }
 0xd6c   :  { %v1854_v31 = vpop.permute.xlu1 %1853  ;;  %v1858_v32 = vrot.slane %v1851_v30, %v1817_v5 }
 0xd6d   :  { %v1862_v33 = vrot.slane %v1854_v31, %v1817_v5 }
 0xd6f   :  { %v1863_v34 = vsel %vm1823_vm5, %v1862_v33, %v1858_v32 }
 0xd70   :  { %v1865_v44 = vsel %vm1826_vm6, %v1863_v34, 0.0 }
 0xd71   :  { %1866 = vadd.xlane.f32.xlu1 %v1865_v44 }
 0xdfe   :  { %v1867_v35 = vpop.xlane.xlu1 %1866 }
 0xdff   :  { %2386 = vrcp.f32 %v1867_v35 }
 0xe09   :  { %v2387_v36 = vpop.eup %2386 }
 0xe0a   :  { %v1873_v37 = vrot.slane %v2387_v36, %v1833_v20  ;;  %v1877_v39 = vrot.slane %v2387_v36, %v1837_v21 }
 0xe0c   :  { %v1880_v38 = vmul.f32 %v2383_v28, %v1873_v37  ;;  %v1881_v40 = vmul.f32 %v2385_v29, %v1877_v39 }
 0xe0e   :  { %1884 = vperm.xlu0 %2344, %v1880_v38  }
 0xe12   :  { %1964 = vperm.xlu0 %2344, %v1881_v40  }
 0xe8d   :  { %v1885_v41 = vpop.permute.xlu0 %1884 }
 0xe8e   :  { %v1889_v42 = vrot.slane %v1885_v41, %v1817_v5 }
 0xe90   :  { %2289 = vmatmul.mubr.msk.f32.vlgmr.msra.gmra.mrb[20].mxu1 %vm345_vm2, %v1889_v42 }
 0xe91   :  { %2292 = vmatpush3.msra.mxu1 %v2847_v53  ;;  %v1965_v45 = vpop.permute.xlu0 %1964  ;;  %2293 = vmatprep.mubr.msk.f32.mxu1 %vm2536_vm1, %v2535_v14 }
 0xe92   :  { %v1969_v46 = vrot.slane %v1965_v45, %v1817_v5 }
 0xe94   :  { %2294 = vmatmul.mubr.msk.f32.vlgmr.msra.gmra.mrb[22].mxu1 %vm345_vm2, %v1969_v46 }
 0xf63   :  { %v1958_v47 = vpop.f32.mrb[20].mxu1 }
 0xf64   :  { %v2290_v48 = vpop.f32.mrb[21].mxu1 }
 0xf67   :  { %v2038_v49 = vpop.f32.mrb[22].mxu1 }
 0xf68   :  { %v2044_v50 = vrot.slane %v2038_v49, 7  ;;  %v2295_v51 = vpop.f32.mrb[23].mxu1 }
 0xf6a   :  { %v2045_v15 = vsel %vm1823_vm5, %v2044_v50, %v1958_v47 }
 0xf6b   :  { %2048 = vst.msk [vmem:[#allocation12] sm:$0x3] %vm2047_vm7, %v2045_v15 }
 0xf6c   :  { %2509 = shalt.err (!%p2506_p2)
}
 0xf6d   :  { %s2510_s0 = scalar_lea.hbm %s2892_s8, 32 }
 0xf6e   :  { %p2511_p3 = scmp.ne.s32.totalorder %s2892_s8, %s2510_s0  ;;  %p2514_p4 = scmp.lt.u32.totalorder %s2510_s0, %s2892_s8 }
 0xf70   :  { %p2516_p5 = pnand %p2514_p4, %p2511_p3 }
 0xf72   :  { %2519 = shalt.err (!%p2516_p5)
}
 0xf73   :  { %2058 = dma.vmem_to_hbm [thread:$0]  %s2056_s7, 32, %s2892_s8, [#allocation5]  }
 0xf74   :  { %2526 = dma.done.wait [#allocation5], 32  }
 0xf75   :  { %2527 = vsyncadd [#allocation5], 4294967264 }
 0xf76   :  { %2062 = vsyncpa [#allocation4], 1 }
 0xf77   :  { %2063 = vsyncpa [#allocation7], 1 }
 0xf78   :  { %2064 = vsyncpa [#allocation10], 1 }
 0xf79   :  { %2065 = vsyncpa [#allocation5], 1 }

</bundles_post_ra>
